<compile_context>
chip_gen: v6e
topology: v6e:2x2x1
jax: 0.10.0
libtpu: 0.0.40
codegen_flags: <defaults>
</compile_context>

<pallas_src>
import jax
import jax.numpy as jnp
from jax.experimental import pallas as pl
from jax.experimental.pallas import tpu as pltpu

NEG_SLOPE = 0.1   # LeakyReLU negative slope from the torch module


# --------------------------- Pallas kernel ----------------------------------

def _classblock_kernel(x_ref, w_ref, b_ref, o_ref, acc_ref):
    """Computes one (tm, tn) output tile, accumulating over the K grid axis.

    Fuses LeakyReLU(0.1) on the input tile (prologue) and the bias add
    (epilogue) around the MXU matmul.
    """
    k = pl.program_id(2)

    @pl.when(k == 0)
    def _():
        acc_ref[...] = jnp.zeros_like(acc_ref)

    x = x_ref[...]                              # (tm, tk) bf16
    x = jnp.where(x >= 0, x, x * NEG_SLOPE)     # fused LeakyReLU(0.1)
    acc_ref[...] += jnp.dot(x, w_ref[...],
                            preferred_element_type=jnp.float32)

    @pl.when(k == pl.num_programs(2) - 1)
    def _():
        o_ref[...] = (acc_ref[...] + b_ref[...]).astype(o_ref.dtype)


# --------------------------- wrapper -----------------------------------------

def _round_up(x, m):
    return (x + m - 1) // m * m


def _pick_tile(dim, candidates):
    for c in candidates:
        if dim % c == 0:
            return c
    return dim  # small / ragged dim -> single full-extent block


def class_block_forward(params, x, *, out_dtype=jnp.float32):
    """y = Linear(Dropout(LeakyReLU_{0.1}(x)))   (Dropout = eval-mode identity)."""
    M, K = x.shape
    w = params["w"]                    # (K, C): transposed torch Linear weight
    b = params["b"]                    # (C,)
    C = w.shape[1]

    # Pad to vreg/MXU-friendly multiples (8 sublanes, 128 lanes) so all loads
    # and stores are unmasked and lane-dense; slice the result afterwards.
    Mp = _round_up(M, 8)
    Kp = _round_up(K, 128)
    Cp = _round_up(C, 128)

    tm = _pick_tile(Mp, (256, 128))
    tn = _pick_tile(Cp, (256, 128))
    tk = _pick_tile(Kp, (512, 256, 128))

    # bf16 operands for the MXU fast path; f32 accumulation inside the kernel.
    xp = jnp.zeros((Mp, Kp), jnp.bfloat16).at[:M, :K].set(x.astype(jnp.bfloat16))
    wp = jnp.zeros((Kp, Cp), jnp.bfloat16).at[:K, :C].set(w.astype(jnp.bfloat16))
    bp = jnp.zeros((1, Cp), jnp.float32).at[0, :C].set(b.astype(jnp.float32))

    grid = (Mp // tm, Cp // tn, Kp // tk)

    out = pl.pallas_call(
        _classblock_kernel,
        grid_spec=pltpu.PrefetchScalarGridSpec(
            num_scalar_prefetch=0,
            grid=grid,
            in_specs=[
                pl.BlockSpec((tm, tk), lambda i, j, k: (i, k)),
                pl.BlockSpec((tk, tn), lambda i, j, k: (k, j)),
                pl.BlockSpec((1, tn), lambda i, j, k: (0, j)),
            ],
            out_specs=pl.BlockSpec((tm, tn), lambda i, j, k: (i, j)),
            scratch_shapes=[pltpu.VMEM((tm, tn), jnp.float32)],
        ),
        out_shape=jax.ShapeDtypeStruct((Mp, Cp), out_dtype),
        compiler_params=pltpu.CompilerParams(
            dimension_semantics=("parallel", "parallel", "arbitrary")),
    )(xp, wp, bp)

    return out[:M, :C]


# --------------------------- parameters (deterministic) ----------------------

def init_classblock_params(key, input_dim, class_num):
    # weights_init_classifier: Linear weight ~ N(0, 0.001), bias = 0.
    w = 0.001 * jax.random.normal(key, (input_dim, class_num), jnp.float32)
    b = jnp.zeros((class_num,), jnp.float32)
    return {"w": w, "b": b}


# --------------------------- demo / self-check --------------------------------

if __name__ == "__main__":
    key = jax.random.PRNGKey(0)
    kp, kx = jax.random.split(key)

    batch, input_dim, class_num = 16, 512, 256
    params = init_classblock_params(kp, input_dim, class_num)
    x = jax.random.normal(kx, (batch, input_dim), jnp.float32)

    out = jax.block_until_ready(class_block_forward(params, x))
    assert out.shape == (batch, class_num), out.shape
    assert bool(jnp.all(jnp.isfinite(out)))

    # Pure-JAX reference (eval-mode forward); loose tolerance for bf16 MXU path.
    x_act = jnp.where(x >= 0, x, NEG_SLOPE * x)
    ref = x_act @ params["w"] + params["b"]
    assert bool(jnp.allclose(out, ref, rtol=1e-1, atol=1e-2)), (
        float(jnp.max(jnp.abs(out - ref))))

    print("KERNEL_OK")
</pallas_src>

<mosaic_0001>
module attributes {stable_mosaic.version = 11 : i64} {
  func.func @_classblock_kernel(%arg0: i32, %arg1: i32, %arg2: i32, %arg3: memref<16x512xbf16, #tpu.memory_space<vmem>>, %arg4: memref<512x256xbf16, #tpu.memory_space<vmem>>, %arg5: memref<1x256xf32, #tpu.memory_space<vmem>>, %arg6: memref<16x256xf32, #tpu.memory_space<vmem>>, %arg7: memref<16x256xf32, #tpu.memory_space<vmem>>) attributes {dimension_semantics = [#tpu.dimension_semantics<parallel>, #tpu.dimension_semantics<parallel>, #tpu.dimension_semantics<arbitrary>], iteration_bounds = array<i64: 1, 1, 1>, scalar_prefetch = 0 : i64, scratch_operands = 1 : i64, tpu.core_type = #tpu.core_type<tc>, window_params = [{transform_indices = @transform_0, window_bounds = array<i64: 16, 512>}, {transform_indices = @transform_1, window_bounds = array<i64: 512, 256>}, {transform_indices = @transform_2, window_bounds = array<i64: 1, 256>}, {transform_indices = @transform_3, window_bounds = array<i64: 16, 256>}]} {
    %c0_i32 = arith.constant 0 : i32
    %0 = arith.cmpi eq, %arg2, %c0_i32 : i32
    %1 = arith.extui %0 : i1 to i32
    %c0_i32_0 = arith.constant 0 : i32
    %2 = arith.cmpi ne, %1, %c0_i32_0 : i32
    scf.if %2 {
      %cst_12 = arith.constant 0.000000e+00 : f32
      %17 = vector.broadcast %cst_12 : f32 to vector<16x256xf32>
      %c0_13 = arith.constant 0 : index
      %c0_14 = arith.constant 0 : index
      %18 = vector.load %arg7[%c0_13, %c0_14] : memref<16x256xf32, #tpu.memory_space<vmem>>, vector<16x256xf32>
      tpu.vector_store %arg7[%c0_13, %c0_14], %17 {strides = array<i32>} : memref<16x256xf32, #tpu.memory_space<vmem>>, vector<16x256xf32>,
    } else {
    }
    %c0 = arith.constant 0 : index
    %c0_1 = arith.constant 0 : index
    %3 = vector.load %arg3[%c0, %c0_1] : memref<16x512xbf16, #tpu.memory_space<vmem>>, vector<16x512xbf16>
    %cst = arith.constant 0.000000e+00 : bf16
    %4 = vector.broadcast %cst : bf16 to vector<16x512xbf16>
    %5 = arith.cmpf oge, %3, %4 : vector<16x512xbf16>
    %cst_2 = arith.constant 1.000980e-01 : bf16
    %6 = vector.broadcast %cst_2 : bf16 to vector<16x512xbf16>
    %7 = arith.mulf %3, %6 : vector<16x512xbf16>
    %8 = arith.select %5, %3, %7 : vector<16x512xi1>, vector<16x512xbf16>
    %c0_3 = arith.constant 0 : index
    %c0_4 = arith.constant 0 : index
    %9 = vector.load %arg7[%c0_3, %c0_4] : memref<16x256xf32, #tpu.memory_space<vmem>>, vector<16x256xf32>
    %c0_5 = arith.constant 0 : index
    %c0_6 = arith.constant 0 : index
    %10 = vector.load %arg4[%c0_5, %c0_6] : memref<512x256xbf16, #tpu.memory_space<vmem>>, vector<512x256xbf16>
    %cst_7 = arith.constant dense<0.000000e+00> : vector<16x256xf32>
    %11 = tpu.matmul %8, %10, %cst_7 {dimension_numbers = #tpu.dot_dimension_numbers<[1], [0], [0], [1], [0, 0, 1, 1], [], []>} : vector<16x512xbf16>, vector<512x256xbf16>, vector<16x256xf32> -> vector<16x256xf32>
    %12 = arith.addf %9, %11 : vector<16x256xf32>
    %c0_8 = arith.constant 0 : index
    %c0_9 = arith.constant 0 : index
    %13 = vector.load %arg7[%c0_8, %c0_9] : memref<16x256xf32, #tpu.memory_space<vmem>>, vector<16x256xf32>
    tpu.vector_store %arg7[%c0_8, %c0_9], %12 {strides = array<i32>} : memref<16x256xf32, #tpu.memory_space<vmem>>, vector<16x256xf32>,
    %c0_i32_10 = arith.constant 0 : i32
    %14 = arith.cmpi eq, %arg2, %c0_i32_10 : i32
    %15 = arith.extui %14 : i1 to i32
    %c0_i32_11 = arith.constant 0 : i32
    %16 = arith.cmpi ne, %15, %c0_i32_11 : i32
    scf.if %16 {
      %c0_12 = arith.constant 0 : index
      %c0_13 = arith.constant 0 : index
      %17 = vector.load %arg7[%c0_12, %c0_13] : memref<16x256xf32, #tpu.memory_space<vmem>>, vector<16x256xf32>
      %c0_14 = arith.constant 0 : index
      %c0_15 = arith.constant 0 : index
      %18 = vector.load %arg5[%c0_14, %c0_15] : memref<1x256xf32, #tpu.memory_space<vmem>>, vector<1x256xf32>
      %19 = vector.broadcast %18 : vector<1x256xf32> to vector<16x256xf32>
      %20 = arith.addf %17, %19 : vector<16x256xf32>
      %c0_16 = arith.constant 0 : index
      %c0_17 = arith.constant 0 : index
      %21 = vector.load %arg6[%c0_16, %c0_17] : memref<16x256xf32, #tpu.memory_space<vmem>>, vector<16x256xf32>
      tpu.vector_store %arg6[%c0_16, %c0_17], %20 {strides = array<i32>} : memref<16x256xf32, #tpu.memory_space<vmem>>, vector<16x256xf32>,
    } else {
    }
    return
  }
  func.func @transform_0(%arg0: i32, %arg1: i32, %arg2: i32) -> (i32, i32) {
    %c0_i32 = arith.constant 0 : i32
    return %arg0, %arg2 : i32, i32
  }
  func.func @transform_1(%arg0: i32, %arg1: i32, %arg2: i32) -> (i32, i32) {
    %c0_i32 = arith.constant 0 : i32
    return %arg2, %arg1 : i32, i32
  }
  func.func @transform_2(%arg0: i32, %arg1: i32, %arg2: i32) -> (i32, i32) {
    %c0_i32 = arith.constant 0 : i32
    %c0_i32_0 = arith.constant 0 : i32
    return %c0_i32, %arg1 : i32, i32
  }
  func.func @transform_3(%arg0: i32, %arg1: i32, %arg2: i32) -> (i32, i32) {
    %c0_i32 = arith.constant 0 : i32
    return %arg0, %arg1 : i32, i32
  }
}

</mosaic_0001>

<bundles_post_ra>
// kernel: tpu_custom_call.1
= control target key start
LH: loop header
LB: loop body
LE: loop exit
PB: predicated region body
PF: predicated region fallthrough
CT: control target
= control target key end

     0   :  { %8 = vsyncpa [#allocation4], 0  ;;  %s898_s0 = inlined_call_operand.hbm [shape: bf16[16,512], index: 0, kind: input, shape index: {}]   ;;  %s899_s1 = inlined_call_operand.hbm [shape: bf16[512,256], index: 1, kind: input, shape index: {}]   ;;  %s900_s2 = inlined_call_operand.vmem [shape: f32[1,256], index: 2, kind: input, shape index: {}]   ;;  %s901_s3 = inlined_call_operand.hbm [shape: f32[16,256], index: 3, kind: output, shape index: {}]  }
   0x1   :  { %9 = vsyncpa [#allocation7], 0 }
   0x2   :  { %10 = vsyncpa [#allocation5], 0  ;;  %s853_s12 = smov [#allocation3]  }
   0x3   :  { %s16_s13 = sshll.u32 %s853_s12, 4  ;;  %s17_s13 = int_to_ptr.vmem [resolvable:$true] %s16_s13 }
   0x4   :  { %s795_s14 = scalar_lea.vmem %s17_s13, 512  ;;  %p800_p1 = scmp.lt.s32.totalorder %s17_s13, %s17_s13 }
   0x5   :  { %p796_p0 = scmp.ne.s32.totalorder %s17_s13, %s795_s14  ;;  %p801_p2 = scmp.lt.s32.totalorder %s795_s14, %s795_s14 }
   0x7   :  { %p802_p3 = por %p801_p2, %p800_p1 }
   0x9   :  { %p803_p4 = pnand %p802_p3, %p796_p0 }
   0xb   :  { %806 = shalt.err (!%p803_p4)
}
   0xc   :  { %s854_s15 = smov 256   ;;  %s855_s16 = smov 16  }
   0xd   :  { %22 = dma.hbm_to_vmem [thread:$0]  %s898_s0, 512, %s17_s13, [#allocation4], %s854_s15, %s854_s15, %s855_s16  }
   0xe   :  { %s856_s19 = smov [#allocation6]  }
   0xf   :  { %s28_s20 = sshll.u32 %s856_s19, 4  ;;  %s29_s20 = int_to_ptr.vmem [resolvable:$true] %s28_s20 }
  0x10   :  { %s815_s21 = scalar_lea.vmem %s29_s20, 8192  ;;  %p820_p6 = scmp.lt.s32.totalorder %s29_s20, %s29_s20 }
  0x11   :  { %p816_p5 = scmp.ne.s32.totalorder %s29_s20, %s815_s21  ;;  %p821_p7 = scmp.lt.s32.totalorder %s815_s21, %s815_s21 }
  0x13   :  { %p822_p8 = por %p821_p7, %p820_p6 }
  0x15   :  { %p823_p9 = pnand %p822_p8, %p816_p5 }
  0x17   :  { %826 = shalt.err (!%p823_p9)
}
  0x18   :  { %s857_s22 = smov 128   ;;  %s858_s23 = smov 8  }
  0x19   :  { %34 = dma.hbm_to_vmem [thread:$0]  %s899_s1, 8192, %s29_s20, [#allocation7], %s857_s22, %s857_s22, %s858_s23  }
  0x1a   :  { %847 = dma.done.wait [#allocation4], 512  }
  0x1b   :  { %848 = vsyncadd [#allocation4], 4294966784 }
  0x1c   :  { %849 = dma.done.wait [#allocation7], 8192  }
  0x1d   :  { %850 = vsyncadd [#allocation7], 4294959104  ;;  %v691_v0 = vld [vmem:[#allocation6 + $0x74] ss:$8 sps:$4 sm:$0xff]   ;;  %v695_v2 = vld [vmem:[#allocation6 + $0x70] ss:$8 sps:$4 sm:$0xff]  }
  0x1e   :  { %v693_v1 = vld [vmem:[#allocation6 + $0x174] ss:$8 sps:$4 sm:$0xff]   ;;  %477 = vmatprep.subr.bf16.mxu0 %v691_v0  ;;  %v696_v3 = vld [vmem:[#allocation6 + $0x170] ss:$8 sps:$4 sm:$0xff]   ;;  %v697_v4 = vld [vmem:[#allocation6 + $0x64] ss:$8 sps:$4 sm:$0xff]  }
  0x1f   :  { %520 = vmatprep.subr.bf16.mxu1 %v693_v1  ;;  %478 = vmatpush1.bf16.msra.mxu0 %v695_v2  ;;  %v699_v5 = vld [vmem:[#allocation6 + $0x164] ss:$8 sps:$4 sm:$0xff]   ;;  %v701_v6 = vld [vmem:[#allocation6 + $0x60] ss:$8 sps:$4 sm:$0xff]   ;;  %v703_v8 = vld [vmem:[#allocation6 + $0x54] ss:$8 sps:$4 sm:$0xff]  }
  0x20   :  { %521 = vmatpush1.bf16.msra.mxu1 %v696_v3  ;;  %479 = vmatprep.subr.bf16.mxu0 %v697_v4  ;;  %v702_v7 = vld [vmem:[#allocation6 + $0x160] ss:$8 sps:$4 sm:$0xff]   ;;  %v705_v9 = vld [vmem:[#allocation6 + $0x154] ss:$8 sps:$4 sm:$0xff]   ;;  %v707_v10 = vld [vmem:[#allocation6 + $0x50] ss:$8 sps:$4 sm:$0xff]  }
  0x21   :  { %522 = vmatprep.subr.bf16.mxu1 %v699_v5  ;;  %v708_v11 = vld [vmem:[#allocation6 + $0x150] ss:$8 sps:$4 sm:$0xff]   ;;  %v709_v12 = vld [vmem:[#allocation6 + $0x44] ss:$8 sps:$4 sm:$0xff]   ;;  %v713_v14 = vld [vmem:[#allocation6 + $0x40] ss:$8 sps:$4 sm:$0xff]  }
  0x22   :  { %v711_v13 = vld [vmem:[#allocation6 + $0x144] ss:$8 sps:$4 sm:$0xff]   ;;  %v714_v15 = vld [vmem:[#allocation6 + $0x140] ss:$8 sps:$4 sm:$0xff]   ;;  %v715_v16 = vld [vmem:[#allocation6 + $0x34] ss:$8 sps:$4 sm:$0xff]  }
  0x23   :  { %480 = vmatpush1.bf16.msra.mxu0 %v701_v6  ;;  %v717_v17 = vld [vmem:[#allocation6 + $0x134] ss:$8 sps:$4 sm:$0xff]   ;;  %v719_v18 = vld [vmem:[#allocation6 + $0x30] ss:$8 sps:$4 sm:$0xff]   ;;  %v721_v20 = vld [vmem:[#allocation6 + $0x24] ss:$8 sps:$4 sm:$0xff]  }
  0x24   :  { %523 = vmatpush1.bf16.msra.mxu1 %v702_v7  ;;  %481 = vmatprep.subr.bf16.mxu0 %v703_v8  ;;  %v720_v19 = vld [vmem:[#allocation6 + $0x130] ss:$8 sps:$4 sm:$0xff]   ;;  %v723_v21 = vld [vmem:[#allocation6 + $0x124] ss:$8 sps:$4 sm:$0xff]   ;;  %v725_v22 = vld [vmem:[#allocation6 + $0x20] ss:$8 sps:$4 sm:$0xff]  }
  0x25   :  { %524 = vmatprep.subr.bf16.mxu1 %v705_v9  ;;  %v726_v23 = vld [vmem:[#allocation6 + $0x120] ss:$8 sps:$4 sm:$0xff]   ;;  %v727_v24 = vld [vmem:[#allocation6 + $0x14] ss:$8 sps:$4 sm:$0xff]   ;;  %v731_v26 = vld [vmem:[#allocation6 + $0x10] ss:$8 sps:$4 sm:$0xff]  }
  0x26   :  { %v729_v25 = vld [vmem:[#allocation6 + $0x114] ss:$8 sps:$4 sm:$0xff]   ;;  %v732_v27 = vld [vmem:[#allocation6 + $0x110] ss:$8 sps:$4 sm:$0xff]   ;;  %v733_v28 = vld [vmem:[#allocation6 + $0x4] ss:$8 sps:$4 sm:$0xff]  }
  0x27   :  { %482 = vmatpush1.bf16.msra.mxu0 %v707_v10  ;;  %v735_v29 = vld [vmem:[#allocation6 + $0x104] ss:$8 sps:$4 sm:$0xff]   ;;  %v737_v30 = vld [vmem:[#allocation6] ss:$8 sps:$4 sm:$0xff]   ;;  %v739_v32 = vld [vmem:[#allocation6 + $0xf4] ss:$8 sps:$4 sm:$0xff]  }
  0x28   :  { %525 = vmatpush1.bf16.msra.mxu1 %v708_v11  ;;  %483 = vmatprep.subr.bf16.mxu0 %v709_v12  ;;  %v738_v31 = vld [vmem:[#allocation6 + $0x100] ss:$8 sps:$4 sm:$0xff]   ;;  %v741_v33 = vld [vmem:[#allocation6 + $0x1f4] ss:$8 sps:$4 sm:$0xff]   ;;  %v743_v34 = vld [vmem:[#allocation6 + $0xf0] ss:$8 sps:$4 sm:$0xff]  }
  0x29   :  { %526 = vmatprep.subr.bf16.mxu1 %v711_v13  ;;  %v744_v35 = vld [vmem:[#allocation6 + $0x1f0] ss:$8 sps:$4 sm:$0xff]   ;;  %v745_v36 = vld [vmem:[#allocation6 + $0xe4] ss:$8 sps:$4 sm:$0xff]   ;;  %v749_v38 = vld [vmem:[#allocation6 + $0xe0] ss:$8 sps:$4 sm:$0xff]  }
  0x2a   :  { %v747_v37 = vld [vmem:[#allocation6 + $0x1e4] ss:$8 sps:$4 sm:$0xff]   ;;  %v750_v39 = vld [vmem:[#allocation6 + $0x1e0] ss:$8 sps:$4 sm:$0xff]   ;;  %v751_v40 = vld [vmem:[#allocation6 + $0xd4] ss:$8 sps:$4 sm:$0xff]  }
  0x2b   :  { %484 = vmatpush1.bf16.msra.mxu0 %v713_v14  ;;  %v753_v41 = vld [vmem:[#allocation6 + $0x1d4] ss:$8 sps:$4 sm:$0xff]   ;;  %v755_v42 = vld [vmem:[#allocation6 + $0xd0] ss:$8 sps:$4 sm:$0xff]   ;;  %v757_v44 = vld [vmem:[#allocation6 + $0xc4] ss:$8 sps:$4 sm:$0xff]  }
  0x2c   :  { %527 = vmatpush1.bf16.msra.mxu1 %v714_v15  ;;  %485 = vmatprep.subr.bf16.mxu0 %v715_v16  ;;  %v756_v43 = vld [vmem:[#allocation6 + $0x1d0] ss:$8 sps:$4 sm:$0xff]   ;;  %v759_v45 = vld [vmem:[#allocation6 + $0x1c4] ss:$8 sps:$4 sm:$0xff]   ;;  %v761_v46 = vld [vmem:[#allocation6 + $0xc0] ss:$8 sps:$4 sm:$0xff]   ;;  %v580_v16 = vlaneseq }
  0x2d   :  { %528 = vmatprep.subr.bf16.mxu1 %v717_v17  ;;  %v762_v47 = vld [vmem:[#allocation6 + $0x1c0] ss:$8 sps:$4 sm:$0xff]   ;;  %v763_v49 = vld [vmem:[#allocation6 + $0xb4] ss:$8 sps:$4 sm:$0xff]   ;;  %v767_v63 = vld [vmem:[#allocation6 + $0xb0] ss:$8 sps:$4 sm:$0xff]  }
  0x2e   :  { %v53_v48 = vld [vmem:[#allocation3] sm:$0xff]  ;;  %v55_v50 = vld [vmem:[#allocation3 + $0x10] sm:$0xff]  ;;  %v54_v52 = vld [vmem:[#allocation3 + $0x8] sm:$0xff]  ;;  %v581_v17 = vshrl.u32 %v580_v16, 7  ;;  %s859_s26 = smov [#allocation8]  }
  0x2f   :  { %486 = vmatpush1.bf16.msra.mxu0 %v719_v18  ;;  %vm57_vm0 = vcmp.ge.bf16.partialorder %v53_v48, 0  ;;  %v61_v51 = vmul.bf16 1036860877, %v53_v48  ;;  %v56_v53 = vld [vmem:[#allocation3 + $0x18] sm:$0xff]  ;;  %vm59_vm1 = vcmp.ge.bf16.partialorder %v55_v50, 0  ;;  %vm58_vm2 = vcmp.ge.bf16.partialorder %v54_v52, 0 }
  0x30   :  { %529 = vmatpush1.bf16.msra.mxu1 %v720_v19  ;;  %487 = vmatprep.subr.bf16.mxu0 %v721_v20  ;;  %v63_v54 = vmul.bf16 1036860877, %v55_v50  ;;  %vm60_vm3 = vcmp.ge.bf16.partialorder %v56_v53, 0  ;;  %v765_v55 = vld [vmem:[#allocation6 + $0x1b4] ss:$8 sps:$4 sm:$0xff]   ;;  %v582_v18 = vsub.s32 0, %v581_v17 }
  0x31   :  { %530 = vmatprep.subr.bf16.mxu1 %v723_v21  ;;  %v65_v56 = vsel %vm57_vm0, %v53_v48, %v61_v51  ;;  %v62_v57 = vmul.bf16 1036860877, %v54_v52  ;;  %v64_v58 = vmul.bf16 1036860877, %v56_v53  ;;  %v768_v0 = vld [vmem:[#allocation6 + $0x1b0] ss:$8 sps:$4 sm:$0xff]  }
  0x32   :  { %v67_v59 = vsel %vm59_vm1, %v55_v50, %v63_v54  ;;  %v769_v2 = vld [vmem:[#allocation6 + $0xa4] ss:$8 sps:$4 sm:$0xff]   ;;  %v773_v4 = vld [vmem:[#allocation6 + $0xa0] ss:$8 sps:$4 sm:$0xff]   ;;  %v775_v6 = vld [vmem:[#allocation6 + $0x94] ss:$8 sps:$4 sm:$0xff]  }
  0x33   :  { %488 = vmatpush1.bf16.msra.mxu0 %v725_v22  ;;  %v617_v60 = vcombine.high %v65_v56, %v67_v59  ;;  %v66_v61 = vsel %vm58_vm2, %v54_v52, %v62_v57  ;;  %v68_v62 = vsel %vm60_vm3, %v56_v53, %v64_v58  ;;  %v771_v3 = vld [vmem:[#allocation6 + $0x1a4] ss:$8 sps:$4 sm:$0xff]   ;;  %v774_v5 = vld [vmem:[#allocation6 + $0x1a0] ss:$8 sps:$4 sm:$0xff]   ;;  %v777_v7 = vld [vmem:[#allocation6 + $0x194] ss:$8 sps:$4 sm:$0xff]   ;;  %v616_v14 = vcombine.low %v65_v56, %v67_v59 }
  0x34   :  { %531 = vmatpush1.bf16.msra.mxu1 %v726_v23  ;;  %489 = vmatprep.subr.bf16.mxu0 %v727_v24  ;;  %v619_v1 = vcombine.high %v66_v61, %v68_v62  ;;  %v779_v8 = vld [vmem:[#allocation6 + $0x90] ss:$8 sps:$4 sm:$0xff]   ;;  %v781_v10 = vld [vmem:[#allocation6 + $0x84] ss:$8 sps:$4 sm:$0xff]   ;;  %v785_v12 = vld [vmem:[#allocation6 + $0x80] ss:$8 sps:$4 sm:$0xff]   ;;  %v618_v15 = vcombine.low %v66_v61, %v68_v62 }
  0x35   :  { %532 = vmatprep.subr.bf16.mxu1 %v729_v25  ;;  %509 = vmatprep.mubr.bf16.mxu0 %v617_v60  ;;  %v780_v9 = vld [vmem:[#allocation6 + $0x190] ss:$8 sps:$4 sm:$0xff]   ;;  %v783_v11 = vld [vmem:[#allocation6 + $0x184] ss:$8 sps:$4 sm:$0xff]   ;;  %v786_v13 = vld [vmem:[#allocation6 + $0x180] ss:$8 sps:$4 sm:$0xff]  }
  0x36   :  { %552 = vmatprep.mubr.bf16.mxu1 %v619_v1  ;;  %v578_v19 = vld [vmem:[%s900_s2] sm:$0x3]  ;;  %v586_v20 = vsub.s32 1, %v581_v17  ;;  %s603_s27 = sshll.u32 %s859_s26, 4  ;;  %s604_s27 = int_to_ptr.vmem [resolvable:$true] %s603_s27 }
  0x37   :  { %490 = vmatpush1.bf16.msra.mxu0 %v731_v26  ;;  %v583_v21 = vrot.slane %v578_v19, %v582_v18  ;;  %s827_s2 = scalar_lea.vmem %s604_s27, 512  ;;  %p832_p11 = scmp.lt.s32.totalorder %s604_s27, %s604_s27 }
  0x38   :  { %533 = vmatpush1.bf16.msra.mxu1 %v732_v27  ;;  %491 = vmatprep.subr.bf16.mxu0 %v733_v28  ;;  %v587_v25 = vrot.slane %v578_v19, %v586_v20  ;;  %p828_p10 = scmp.ne.s32.totalorder %s604_s27, %s827_s2  ;;  %p833_p12 = scmp.lt.s32.totalorder %s827_s2, %s827_s2 }
  0x39   :  { %534 = vmatprep.subr.bf16.mxu1 %v735_v29 }
  0x3a   :  { %p834_p13 = por %p833_p12, %p832_p11 }
  0x3b   :  { %492 = vmatpush1.bf16.msra.mxu0 %v737_v30 }
  0x3c   :  { %535 = vmatpush1.bf16.msra.mxu1 %v738_v31  ;;  %493 = vmatprep.subr.bf16.mxu0 %v739_v32  ;;  %p835_p0 = pnand %p834_p13, %p828_p10 }
  0x3d   :  { %536 = vmatprep.subr.bf16.mxu1 %v741_v33 }
  0x3f   :  { %494 = vmatpush2.bf16.msra.mxu0 %v743_v34 }
  0x40   :  { %537 = vmatpush2.bf16.msra.mxu1 %v744_v35  ;;  %495 = vmatprep.subr.bf16.mxu0 %v745_v36 }
  0x41   :  { %538 = vmatprep.subr.bf16.mxu1 %v747_v37 }
  0x43   :  { %496 = vmatpush2.bf16.msra.mxu0 %v749_v38 }
  0x44   :  { %539 = vmatpush2.bf16.msra.mxu1 %v750_v39  ;;  %497 = vmatprep.subr.bf16.mxu0 %v751_v40 }
  0x45   :  { %540 = vmatprep.subr.bf16.mxu1 %v753_v41 }
  0x47   :  { %498 = vmatpush2.bf16.msra.mxu0 %v755_v42 }
  0x48   :  { %541 = vmatpush2.bf16.msra.mxu1 %v756_v43  ;;  %499 = vmatprep.subr.bf16.mxu0 %v757_v44 }
  0x49   :  { %542 = vmatprep.subr.bf16.mxu1 %v759_v45 }
  0x4b   :  { %500 = vmatpush2.bf16.msra.mxu0 %v761_v46 }
  0x4c   :  { %543 = vmatpush2.bf16.msra.mxu1 %v762_v47  ;;  %501 = vmatprep.subr.bf16.mxu0 %v763_v49 }
  0x4d   :  { %544 = vmatprep.subr.bf16.mxu1 %v765_v55 }
  0x4f   :  { %502 = vmatpush2.bf16.msra.mxu0 %v767_v63 }
  0x50   :  { %545 = vmatpush2.bf16.msra.mxu1 %v768_v0  ;;  %503 = vmatprep.subr.bf16.mxu0 %v769_v2 }
  0x51   :  { %546 = vmatprep.subr.bf16.mxu1 %v771_v3 }
  0x53   :  { %504 = vmatpush2.bf16.msra.mxu0 %v773_v4 }
  0x54   :  { %547 = vmatpush2.bf16.msra.mxu1 %v774_v5  ;;  %505 = vmatprep.subr.bf16.mxu0 %v775_v6 }
  0x55   :  { %548 = vmatprep.subr.bf16.mxu1 %v777_v7 }
  0x57   :  { %506 = vmatpush2.bf16.msra.mxu0 %v779_v8 }
  0x58   :  { %549 = vmatpush2.bf16.msra.mxu1 %v780_v9  ;;  %507 = vmatprep.subr.bf16.mxu0 %v781_v10 }
  0x59   :  { %550 = vmatprep.subr.bf16.mxu1 %v783_v11 }
  0x5b   :  { %508 = vmatpush2.bf16.msra.mxu0 %v785_v12 }
  0x5c   :  { %551 = vmatpush2.bf16.msra.mxu1 %v786_v13 }
  0x5e   :  { %510 = vmatmul.mubr.bf16.vlgmr.msra.gmra.mxu0 %v616_v14 }
  0x5f   :  { %553 = vmatmul.mubr.bf16.vlgmr.msra.gmra.mxu1 %v618_v15 }
 0x11e   :  { %v511_v22 = vpop.f32.mrf.mxu0 }
 0x11f   :  { %v554_v23 = vpop.f32.mrf.mxu1 }
 0x120   :  { %v555_v24 = vadd.f32 %v554_v23, %v511_v22  ;;  %v513_v26 = vpop.f32.mrf.mxu0 }
 0x121   :  { %v556_v27 = vpop.f32.mrf.mxu1 }
 0x122   :  { %v590_v28 = vadd.f32 %v583_v21, %v555_v24  ;;  %v557_v29 = vadd.f32 %v556_v27, %v513_v26  ;;  %v515_v30 = vpop.f32.mrf.mxu0 }
 0x123   :  { %v558_v31 = vpop.f32.mrf.mxu1 }
 0x124   :  { %594 = vst [vmem:[#allocation8] sm:$0xff] %v590_v28  ;;  %v591_v32 = vadd.f32 %v587_v25, %v557_v29  ;;  %v559_v33 = vadd.f32 %v558_v31, %v515_v30  ;;  %v517_v34 = vpop.f32.mrf.mxu0 }
 0x125   :  { %v560_v35 = vpop.f32.mrf.mxu1 }
 0x126   :  { %595 = vst [vmem:[#allocation8 + $0x8] sm:$0xff] %v591_v32  ;;  %v592_v36 = vadd.f32 %v583_v21, %v559_v33  ;;  %v561_v37 = vadd.f32 %v560_v35, %v517_v34 }
 0x128   :  { %596 = vst [vmem:[#allocation8 + $0x10] sm:$0xff] %v592_v36  ;;  %v593_v38 = vadd.f32 %v587_v25, %v561_v37 }
 0x12a   :  { %597 = vst [vmem:[#allocation8 + $0x18] sm:$0xff] %v593_v38 }
 0x12b   :  { %838 = shalt.err (!%p835_p0)
}
 0x12c   :  { %609 = dma.vmem_to_hbm [thread:$0]  %s604_s27, 512, %s901_s3, [#allocation5], %s854_s15, %s854_s15, %s855_s16  }
 0x12d   :  { %851 = dma.done.wait [#allocation5], 512  }
 0x12e   :  { %852 = vsyncadd [#allocation5], 4294966784 }
 0x12f   :  { %613 = vsyncpa [#allocation4], 1 }
 0x130   :  { %614 = vsyncpa [#allocation7], 1 }
 0x131   :  { %615 = vsyncpa [#allocation5], 1 }

</bundles_post_ra>
